<compile_context>
chip_gen: v7x
topology: tpu7x:2x2x1
jax: 0.10.0
libtpu: 0.0.40
codegen_flags: <defaults>
</compile_context>

<pallas_src>
import jax
import jax.numpy as jnp
import numpy as np
from jax.experimental import pallas as pl
from jax.experimental.pallas import tpu as pltpu

_LANE = 128
_MIB = 1024 * 1024
_TARGET_STEP_BYTES = 8 * _MIB  # single-buffer (in+out tile) bytes per grid step


def _round_up(a, b):
    return (a + b - 1) // b * b


def _vmem_limit_bytes():
    """Generation-aware scoped-VMEM limit: half of physical VMEM, <=64 MiB."""
    try:
        cap = int(pltpu.get_tpu_info().vmem_capacity_bytes)
    except Exception:
        cap = 64 * _MIB  # assume the smallest (v7x: 64 MiB per TensorCore)
    return max(16 * _MIB, min(cap // 2, 64 * _MIB))


def _select_tiles(B, L, C, itemsize, vmem_limit, step_budget=None):
    """Pick (TB, TL) tile sizes over the batch and token axes.

    Budget accounts for the input tile's channel (lane) axis padding to 128
    and for 2x double buffering of both the input and output tiles.
    """
    c_in_pad = _round_up(C, _LANE)   # input block last dim pads to 128 lanes
    c_out_pad = _round_up(C, 8)      # output block sublane dim pads to 8
    bytes_per_token = (c_in_pad + c_out_pad) * itemsize

    if step_budget is None:
        # /4: two arrays x double buffering, plus compiler-scratch headroom.
        step_budget = min(_TARGET_STEP_BYTES, vmem_limit // 4)

    L_pad = _round_up(L, _LANE)
    max_tokens = max(_LANE, (step_budget // bytes_per_token) // _LANE * _LANE)

    if max_tokens < L_pad:
        # Large-L path: lane-dense 128-multiple token tile; cdiv grid masks edge.
        return 1, int(max_tokens)

    # Small-L path: whole token axis per step (full-extent block is legal even
    # when L is not a multiple of 128); tile over batch for per-step volume.
    tb = max(1, int(step_budget // (bytes_per_token * max(L, 1))))
    tb = min(B, tb)
    if B >= 2:
        tb = min(tb, max(1, B // 2))  # keep >=2 grid steps for megacore/pipelining
    return int(tb), int(L)


def _unembed_kernel_2d(x_ref, o_ref):
    # x_ref: (TL, C) -> o_ref: (C, TL); XLU transpose of the VMEM tile.
    o_ref[...] = x_ref[...].T


def _unembed_kernel_3d(x_ref, o_ref):
    # x_ref: (TB, TL, C) -> o_ref: (TB, C, TL)
    o_ref[...] = jnp.swapaxes(x_ref[...], 1, 2)


def patch_unembed(x, x_size, step_budget_bytes=None):
    """PatchUnEmbed.forward:  x (B, H*W, C) -> (B, C, H, W)."""
    H, W = x_size
    B, L, C = x.shape
    assert L == H * W, "sequence length must equal H*W"

    itemsize = jnp.dtype(x.dtype).itemsize
    vmem_limit = _vmem_limit_bytes()
    TB, TL = _select_tiles(B, L, C, itemsize, vmem_limit, step_budget_bytes)

    grid = (pl.cdiv(B, TB), pl.cdiv(L, TL))

    if TB == 1:
        kernel = _unembed_kernel_2d
        in_spec = pl.BlockSpec((None, TL, C), lambda b, l: (b, l, 0))
        out_spec = pl.BlockSpec((None, C, TL), lambda b, l: (b, 0, l))
    else:
        kernel = _unembed_kernel_3d
        in_spec = pl.BlockSpec((TB, TL, C), lambda b, l: (b, l, 0))
        out_spec = pl.BlockSpec((TB, C, TL), lambda b, l: (b, 0, l))

    out3 = pl.pallas_call(
        kernel,
        out_shape=jax.ShapeDtypeStruct((B, C, L), x.dtype),
        grid=grid,
        in_specs=[in_spec],
        out_specs=out_spec,
        compiler_params=pltpu.CompilerParams(
            dimension_semantics=("parallel", "parallel"),
            vmem_limit_bytes=int(vmem_limit),
        ),
        cost_estimate=pl.CostEstimate(
            flops=0, transcendentals=0,
            bytes_accessed=2 * B * L * C * itemsize),
    )(x)

    # Row-major (B, C, L) -> (B, C, H, W): metadata-only view, no data movement.
    return out3.reshape(B, C, H, W)


def patch_unembed_reference(x, x_size):
    """Pure-JAX reference matching the PyTorch semantics."""
    H, W = x_size
    B, L, C = x.shape
    return jnp.transpose(x, (0, 2, 1)).reshape(B, C, H, W)


if __name__ == "__main__":
    key = jax.random.PRNGKey(0)
    k1, k2, k3 = jax.random.split(key, 3)

    # Test 1: module-default-like shape (embed_dim=96, 16x16 tokens).
    B, H, W, C = 2, 16, 16, 96
    x1 = jax.random.normal(k1, (B, H * W, C), jnp.float32)
    out1 = jax.block_until_ready(patch_unembed(x1, (H, W)))
    ref1 = patch_unembed_reference(x1, (H, W))
    assert out1.shape == (B, C, H, W)
    np.testing.assert_allclose(np.asarray(out1), np.asarray(ref1), rtol=0, atol=0)

    # Test 2: L not a multiple of 128 (full-extent small-L path).
    H2, W2 = 17, 17
    x2 = jax.random.normal(k2, (2, H2 * W2, C), jnp.float32)
    out2 = jax.block_until_ready(patch_unembed(x2, (H2, W2)))
    ref2 = patch_unembed_reference(x2, (H2, W2))
    np.testing.assert_allclose(np.asarray(out2), np.asarray(ref2), rtol=0, atol=0)

    # Test 3: force the tiled 128-multiple-TL path with a masked edge block,
    # using a small per-step budget so the shape stays small.
    H3, W3 = 17, 19  # L = 323
    x3 = jax.random.normal(k3, (2, H3 * W3, C), jnp.float32)
    out3 = jax.block_until_ready(
        patch_unembed(x3, (H3, W3), step_budget_bytes=128 * 1024))
    ref3 = patch_unembed_reference(x3, (H3, W3))
    np.testing.assert_allclose(np.asarray(out3), np.asarray(ref3), rtol=0, atol=0)

    print("KERNEL_OK")
</pallas_src>

<mosaic_0001>
module attributes {stable_mosaic.version = 11 : i64} {
  func.func @_unembed_kernel_2d(%arg0: i32, %arg1: i32, %arg2: memref<1x256x96xf32, #tpu.memory_space<vmem>>, %arg3: memref<1x96x256xf32, #tpu.memory_space<vmem>>) attributes {dimension_semantics = [#tpu.dimension_semantics<parallel>, #tpu.dimension_semantics<parallel>], iteration_bounds = array<i64: 2, 1>, scalar_prefetch = 0 : i64, scratch_operands = 0 : i64, tpu.core_type = #tpu.core_type<tc>, window_params = [{transform_indices = @transform_0, window_bounds = array<i64: 1, 256, 96>}, {transform_indices = @transform_1, window_bounds = array<i64: 1, 96, 256>}]} {
    %c0 = arith.constant 0 : index
    %c0_0 = arith.constant 0 : index
    %c0_1 = arith.constant 0 : index
    %0 = vector.load %arg2[%c0, %c0_0, %c0_1] : memref<1x256x96xf32, #tpu.memory_space<vmem>>, vector<1x256x96xf32>
    %1 = vector.shape_cast %0 : vector<1x256x96xf32> to vector<256x96xf32>
    %2 = tpu.transpose %1, [1, 0] : vector<256x96xf32> -> vector<96x256xf32>
    %c0_2 = arith.constant 0 : index
    %c0_3 = arith.constant 0 : index
    %c0_4 = arith.constant 0 : index
    %3 = vector.load %arg3[%c0_2, %c0_3, %c0_4] : memref<1x96x256xf32, #tpu.memory_space<vmem>>, vector<1x96x256xf32>
    %4 = vector.shape_cast %3 : vector<1x96x256xf32> to vector<96x256xf32>
    %5 = vector.shape_cast %2 : vector<96x256xf32> to vector<1x96x256xf32>
    tpu.vector_store %arg3[%c0_2, %c0_3, %c0_4], %5 {strides = array<i32>} : memref<1x96x256xf32, #tpu.memory_space<vmem>>, vector<1x96x256xf32>,
    return
  }
  func.func @transform_0(%arg0: i32, %arg1: i32) -> (i32, i32, i32) {
    %c0_i32 = arith.constant 0 : i32
    %c0_i32_0 = arith.constant 0 : i32
    return %arg0, %arg1, %c0_i32 : i32, i32, i32
  }
  func.func @transform_1(%arg0: i32, %arg1: i32) -> (i32, i32, i32) {
    %c0_i32 = arith.constant 0 : i32
    %c0_i32_0 = arith.constant 0 : i32
    return %arg0, %c0_i32, %arg1 : i32, i32, i32
  }
}

</mosaic_0001>

<bundles_post_ra>
// kernel: tpu_custom_call.1
= control target key start
LH: loop header
LB: loop body
LE: loop exit
PB: predicated region body
PF: predicated region fallthrough
CT: control target
= control target key end

     0   :  { %6 = vsyncpa [#allocation3], 0  ;;  %s704_s0 = inlined_call_operand.vmem [shape: f32[2,256,96], index: 0, kind: input, shape index: {}]   ;;  %s705_s1 = inlined_call_operand.hbm [shape: f32[2,96,256], index: 1, kind: output, shape index: {}]  }
   0x1   :  { %8 = vsyncpa [#allocation3 + $0x1], 0  ;;  %s524_s6 = smov 0   ;;  %s526_s7 = smov 0  }
   0x2   :  { %s528_s8 = smov 0   ;;  %s530_s9 = smov 0  }
   0x3   :  { %s532_s10 = smov 0   ;;  %s534_s11 = smov 0  }
   0x4 LB: > { %s361_s12 = sadd.s32 4294967295, %s509_s11   ;;  %s362_s13 = sadd.s32 4294967294, %s509_s11   ;;  %s509_s11 = sphi %s534_s11, %s14_s11   ;;  %s505_s10 = sphi %s532_s10, %s712_s10   ;;  %s501_s9 = sphi %s530_s9, %s711_s9   ;;  %s497_s8 = sphi %s528_s8, %s710_s8   ;;  %s493_s7 = sphi %s526_s7, %s709_s7   ;;  %s489_s6 = sphi %s524_s6, %s708_s6  }
   0x5   : > { %s26_s14 = sadd.s32 1, %s505_s10  ;;  %s63_s15 = sadd.s32 1, %s497_s8 }
   0x6   : > { %p28_p0 = scmp.ge.s32.totalorder %s26_s14, 2  ;;  %p73_p1 = scmp.ne.s32.totalorder %s497_s8, %s493_s7 }
   0x7   : > { %p74_p2 = scmp.eq.s32.totalorder %s361_s12, 1  ;;  %p79_p3 = scmp.ne.s32.totalorder %s493_s7, %s489_s6 }
   0x8   : > { %s714_s14 = smov (%p28_p0, %s26_s14), 0  ;;  %p80_p5 = scmp.eq.s32.totalorder %s362_s13, 1 }
   0x9   : > { %p564_p4 = por %p74_p2, %p73_p1  ;;  %s58_s17 = ssub.s32 %s505_s10, %s714_s14 }
   0xa   : > { %p365_p6 = scmp.ge.s32.totalorder %s509_s11, 1  ;;  %p61_p7 = scmp.eq.s32.totalorder %s58_s17, 0 }
   0xb   : > { %p571_p8 = por %p80_p5, %p79_p3  ;;  %p111_p9 = scmp.lt.s32.totalorder %s509_s11, 3 }
   0xc   : > { %s577_s19 = scalar_select %p61_p7, %s497_s8, %s63_s15  }
   0xd   : > { %p112_p10 = pnand %p365_p6, %p111_p9 }
   0xe   : > { %p136_p11 = scmp.lt.s32.totalorder (!%p112_p10), %s501_s9, 1  ;;  %s132_s25 = sand.u32 (!%p112_p10), 1, %s493_s7  }
   0xf   : > { %115 = sbr.rel (%p112_p10) target bundleno = 216 (0xd8), region = 24  ;;  %s658_s4 = scalar_lea.sflag (!%p112_p10), [#allocation3], %s132_s25 }
  0x10   : > { %s372_s26 = smul.u32 (!%p112_p10), 192, %s132_s25 }
  0x11   : > { %s373_s28 = smul.u32 (!%p112_p10), 3072, %s501_s9 }
  0x12   : > { %s621_s27 = scalar_lea.vmem (!%p112_p10), [#allocation2], %s372_s26 }
  0x13   : > { %s282_s29 = sshll.u32 (!%p112_p10), %s621_s27, 4  ;;  %s650_s3 = scalar_lea.hbm (!%p112_p10), %s705_s1, %s373_s28  ;;  %s652_s29 = int_to_ptr.vmem [resolvable:$true] %s282_s29 }
  0x14   : > { %s431_s5 = scalar_lea.vmem (!%p112_p10), %s652_s29, 3072 }
  0x15   : > { %p432_p12 = scmp.ne.s32.totalorder (!%p112_p10), %s652_s29, %s431_s5 }
  0x16   : > { %s137_s20 = scalar_select %p136_p11, %s501_s9, 1 }
  0x17   : > { %p433_p13 = pnand %p432_p12, %p564_p4  ;;  %s511_s9 = smov [#allocation2]  }
  0x18   : > { %s371_s21 = sshll.u32 %s137_s20, 8  ;;  %s435_s12 = sshll.u32 %s511_s9, 4  ;;  %s436_s12 = int_to_ptr.vmem [resolvable:$false] %s435_s12 }
  0x19   : > { %s584_s24 = scalar_lea.vmem %s704_s0, %s371_s21  ;;  %p434_p0 = pneg %p433_p13 }
  0x1a   : > { %v162_v0 = vld [vmem:[%s584_s24 + $0x80] sm:$0xff]  ;;  %v163_v2 = vld [vmem:[%s584_s24 + $0x88] sm:$0xff]  ;;  %v164_v4 = vld [vmem:[%s584_s24 + $0x90] sm:$0xff]  ;;  %s437_s13 = scalar_lea.vmem %s436_s12, 6144  ;;  %p438_p1 = scmp.lt.s32.totalorder %s652_s29, %s436_s12 }
  0x1b   : > { %v146_v1 = vld [vmem:[%s584_s24] sm:$0xff]  ;;  %210 = vxpose.xlu1.b32.start [1/16] (narrow) %v162_v0, 96  ;;  %v147_v3 = vld [vmem:[%s584_s24 + $0x8] sm:$0xff]  ;;  %v148_v5 = vld [vmem:[%s584_s24 + $0x10] sm:$0xff]  ;;  %p439_p2 = scmp.lt.s32.totalorder %s437_s13, %s431_s5 }
  0x1c   : > { %178 = vxpose.xlu0.b32.start [1/16] (narrow) %v146_v1, 96  ;;  %v165_v6 = vld [vmem:[%s584_s24 + $0x98] sm:$0xff]  ;;  %v166_v8 = vld [vmem:[%s584_s24 + $0xa0] sm:$0xff]  ;;  %v167_v10 = vld [vmem:[%s584_s24 + $0xa8] sm:$0xff] }
  0x1d   : > { %v149_v7 = vld [vmem:[%s584_s24 + $0x18] sm:$0xff]  ;;  %v150_v9 = vld [vmem:[%s584_s24 + $0x20] sm:$0xff]  ;;  %v151_v11 = vld [vmem:[%s584_s24 + $0x28] sm:$0xff]  ;;  %p440_p3 = por %p439_p2, %p438_p1 }
  0x1e   : > { %v168_v12 = vld [vmem:[%s584_s24 + $0xb0] sm:$0xff]  ;;  %v169_v14 = vld [vmem:[%s584_s24 + $0xb8] sm:$0xff]  ;;  %v170_v16 = vld [vmem:[%s584_s24 + $0xc0] sm:$0xff] }
  0x1f   : > { %211 = vxpose.xlu1.b32.cont [2/16] (narrow) %v163_v2, 96  ;;  %v152_v13 = vld [vmem:[%s584_s24 + $0x30] sm:$0xff]  ;;  %v153_v15 = vld [vmem:[%s584_s24 + $0x38] sm:$0xff]  ;;  %v154_v17 = vld [vmem:[%s584_s24 + $0x40] sm:$0xff]  ;;  %p441_p5 = pnand %p440_p3, %p434_p0 }
  0x20   : > { %179 = vxpose.xlu0.b32.cont [2/16] (narrow) %v147_v3, 96  ;;  %v171_v18 = vld [vmem:[%s584_s24 + $0xc8] sm:$0xff]  ;;  %v172_v20 = vld [vmem:[%s584_s24 + $0xd0] sm:$0xff]  ;;  %v173_v22 = vld [vmem:[%s584_s24 + $0xd8] sm:$0xff] }
  0x21   : > { %v155_v19 = vld [vmem:[%s584_s24 + $0x48] sm:$0xff]  ;;  %v156_v21 = vld [vmem:[%s584_s24 + $0x50] sm:$0xff]  ;;  %v157_v23 = vld [vmem:[%s584_s24 + $0x58] sm:$0xff] }
  0x22   : > { %v174_v24 = vld [vmem:[%s584_s24 + $0xe0] sm:$0xff]  ;;  %v175_v26 = vld [vmem:[%s584_s24 + $0xe8] sm:$0xff]  ;;  %v176_v28 = vld [vmem:[%s584_s24 + $0xf0] sm:$0xff] }
  0x23   : > { %212 = vxpose.xlu1.b32.cont [3/16] (narrow) %v164_v4, 96  ;;  %v158_v25 = vld [vmem:[%s584_s24 + $0x60] sm:$0xff]  ;;  %v159_v27 = vld [vmem:[%s584_s24 + $0x68] sm:$0xff]  ;;  %v160_v29 = vld [vmem:[%s584_s24 + $0x70] sm:$0xff] }
  0x24   : > { %180 = vxpose.xlu0.b32.cont [3/16] (narrow) %v148_v5, 96  ;;  %v177_v30 = vld [vmem:[%s584_s24 + $0xf8] sm:$0xff] }
  0x25   : > { %v161_v31 = vld [vmem:[%s584_s24 + $0x78] sm:$0xff] }
  0x27   : > { %213 = vxpose.xlu1.b32.cont [4/16] (narrow) %v165_v6, 96 }
  0x28   : > { %181 = vxpose.xlu0.b32.cont [4/16] (narrow) %v149_v7, 96 }
  0x2b   : > { %214 = vxpose.xlu1.b32.cont [5/16] (narrow) %v166_v8, 96 }
  0x2c   : > { %182 = vxpose.xlu0.b32.cont [5/16] (narrow) %v150_v9, 96 }
  0x2f   : > { %215 = vxpose.xlu1.b32.cont [6/16] (narrow) %v167_v10, 96 }
  0x30   : > { %183 = vxpose.xlu0.b32.cont [6/16] (narrow) %v151_v11, 96 }
  0x33   : > { %216 = vxpose.xlu1.b32.cont [7/16] (narrow) %v168_v12, 96 }
  0x34   : > { %184 = vxpose.xlu0.b32.cont [7/16] (narrow) %v152_v13, 96 }
  0x37   : > { %217 = vxpose.xlu1.b32.cont [8/16] (narrow) %v169_v14, 96 }
  0x38   : > { %185 = vxpose.xlu0.b32.cont [8/16] (narrow) %v153_v15, 96 }
  0x3b   : > { %218 = vxpose.xlu1.b32.cont [9/16] (narrow) %v170_v16, 96 }
  0x3c   : > { %186 = vxpose.xlu0.b32.cont [9/16] (narrow) %v154_v17, 96 }
  0x3f   : > { %219 = vxpose.xlu1.b32.cont [10/16] (narrow) %v171_v18, 96 }
  0x40   : > { %187 = vxpose.xlu0.b32.cont [10/16] (narrow) %v155_v19, 96 }
  0x43   : > { %220 = vxpose.xlu1.b32.cont [11/16] (narrow) %v172_v20, 96 }
  0x44   : > { %188 = vxpose.xlu0.b32.cont [11/16] (narrow) %v156_v21, 96 }
  0x47   : > { %221 = vxpose.xlu1.b32.cont [12/16] (narrow) %v173_v22, 96 }
  0x48   : > { %189 = vxpose.xlu0.b32.cont [12/16] (narrow) %v157_v23, 96 }
  0x4b   : > { %222 = vxpose.xlu1.b32.cont [13/16] (narrow) %v174_v24, 96 }
  0x4c   : > { %190 = vxpose.xlu0.b32.cont [13/16] (narrow) %v158_v25, 96 }
  0x4f   : > { %223 = vxpose.xlu1.b32.cont [14/16] (narrow) %v175_v26, 96 }
  0x50   : > { %191 = vxpose.xlu0.b32.cont [14/16] (narrow) %v159_v27, 96 }
  0x53   : > { %224 = vxpose.xlu1.b32.cont [15/16] (narrow) %v176_v28, 96 }
  0x54   : > { %192 = vxpose.xlu0.b32.cont [15/16] (narrow) %v160_v29, 96 }
  0x57   : > { %225 = vxpose.xlu1.b32.end [16/16] (narrow) %v177_v30, 96 }
  0x58   : > { %193 = vxpose.xlu0.b32.end [16/16] (narrow) %v161_v31, 96 }
  0x9b   : > { %v226_v32 = vpop.trf.xlu1 }
  0x9c   : > { %v194_v33 = vpop.trf.xlu0  ;;  %243 = vst [vmem:[%s621_s27 + $0x8] sm:$0xff] %v226_v32 }
  0x9d   : > { %242 = vst [vmem:[%s621_s27] sm:$0xff] %v194_v33 }
  0x9f   : > { %v227_v34 = vpop.trf.xlu1 }
  0xa0   : > { %v195_v35 = vpop.trf.xlu0  ;;  %245 = vst [vmem:[%s621_s27 + $0x18] sm:$0xff] %v227_v34 }
  0xa1   : > { %244 = vst [vmem:[%s621_s27 + $0x10] sm:$0xff] %v195_v35 }
  0xa3   : > { %v228_v36 = vpop.trf.xlu1 }
  0xa4   : > { %v196_v37 = vpop.trf.xlu0  ;;  %247 = vst [vmem:[%s621_s27 + $0x28] sm:$0xff] %v228_v36 }
  0xa5   : > { %246 = vst [vmem:[%s621_s27 + $0x20] sm:$0xff] %v196_v37 }
  0xa7   : > { %v229_v38 = vpop.trf.xlu1 }
  0xa8   : > { %v197_v39 = vpop.trf.xlu0  ;;  %249 = vst [vmem:[%s621_s27 + $0x38] sm:$0xff] %v229_v38 }
  0xa9   : > { %248 = vst [vmem:[%s621_s27 + $0x30] sm:$0xff] %v197_v39 }
  0xab   : > { %v230_v40 = vpop.trf.xlu1 }
  0xac   : > { %v198_v41 = vpop.trf.xlu0  ;;  %251 = vst [vmem:[%s621_s27 + $0x48] sm:$0xff] %v230_v40 }
  0xad   : > { %250 = vst [vmem:[%s621_s27 + $0x40] sm:$0xff] %v198_v41 }
  0xaf   : > { %v231_v42 = vpop.trf.xlu1 }
  0xb0   : > { %v199_v43 = vpop.trf.xlu0  ;;  %253 = vst [vmem:[%s621_s27 + $0x58] sm:$0xff] %v231_v42 }
  0xb1   : > { %252 = vst [vmem:[%s621_s27 + $0x50] sm:$0xff] %v199_v43 }
  0xb3   : > { %v232_v44 = vpop.trf.xlu1 }
  0xb4   : > { %v200_v45 = vpop.trf.xlu0  ;;  %255 = vst [vmem:[%s621_s27 + $0x68] sm:$0xff] %v232_v44 }
  0xb5   : > { %254 = vst [vmem:[%s621_s27 + $0x60] sm:$0xff] %v200_v45 }
  0xb7   : > { %v233_v46 = vpop.trf.xlu1 }
  0xb8   : > { %v201_v47 = vpop.trf.xlu0  ;;  %257 = vst [vmem:[%s621_s27 + $0x78] sm:$0xff] %v233_v46 }
  0xb9   : > { %256 = vst [vmem:[%s621_s27 + $0x70] sm:$0xff] %v201_v47 }
  0xbb   : > { %v234_v48 = vpop.trf.xlu1 }
  0xbc   : > { %v202_v49 = vpop.trf.xlu0  ;;  %259 = vst [vmem:[%s621_s27 + $0x88] sm:$0xff] %v234_v48 }
  0xbd   : > { %258 = vst [vmem:[%s621_s27 + $0x80] sm:$0xff] %v202_v49 }
  0xbf   : > { %v235_v50 = vpop.trf.xlu1 }
  0xc0   : > { %v203_v51 = vpop.trf.xlu0  ;;  %261 = vst [vmem:[%s621_s27 + $0x98] sm:$0xff] %v235_v50 }
  0xc1   : > { %260 = vst [vmem:[%s621_s27 + $0x90] sm:$0xff] %v203_v51 }
  0xc3   : > { %v236_v52 = vpop.trf.xlu1 }
  0xc4   : > { %v204_v53 = vpop.trf.xlu0  ;;  %263 = vst [vmem:[%s621_s27 + $0xa8] sm:$0xff] %v236_v52 }
  0xc5   : > { %262 = vst [vmem:[%s621_s27 + $0xa0] sm:$0xff] %v204_v53 }
  0xc7   : > { %v237_v54 = vpop.trf.xlu1 }
  0xc8   : > { %v205_v55 = vpop.trf.xlu0  ;;  %265 = vst [vmem:[%s621_s27 + $0xb8] sm:$0xff] %v237_v54 }
  0xc9   : > { %264 = vst [vmem:[%s621_s27 + $0xb0] sm:$0xff] %v205_v55 }
  0xca   : > { %444 = shalt.err (!%p441_p5)
}
  0xcb   : > { %s445_s15 = scalar_lea.hbm %s650_s3, 3072  ;;  %s449_s21 = scalar_lea.hbm %s705_s1, 6144 }
  0xcc   : > { %p446_p6 = scmp.ne.s32.totalorder %s650_s3, %s445_s15  ;;  %p450_p10 = scmp.lt.u32.totalorder %s650_s3, %s705_s1 }
  0xcd   : > { %p451_p11 = scmp.lt.u32.totalorder %s449_s21, %s445_s15  ;;  %p453_p13 = scmp.lt.u32.totalorder %s445_s15, %s650_s3 }
  0xce   : > { %p447_p7 = pnand %p446_p6, %p564_p4 }
  0xcf   : > { %p452_p12 = por %p451_p11, %p450_p10 }
  0xd0   : > { %p448_p9 = pneg %p447_p7 }
  0xd1   : > { %p454_p0 = por %p453_p13, %p452_p12 }
  0xd3   : > { %p455_p1 = pnand %p454_p0, %p448_p9 }
  0xd5   : > { %458 = shalt.err (!%p455_p1)
}
  0xd6   : > { %s512_s24 = smov 256   ;;  %s513_s25 = smov 16  }
  0xd7   : > { %374 = dma.vmem_to_hbm [thread:$0]  (%p564_p4), %s652_s29, 3072, %s650_s3, %s658_s4, %s512_s24, %s512_s24, %s513_s25  }
  0xd8 PF: > { %p380_p2 = scmp.ge.s32.totalorder %s509_s11, 2  ;;  %s297_s26 = sand.u32 1, %s489_s6  }
  0xd9   : > { %s298_s27 = scalar_lea.sflag [#allocation3], %s297_s26 }
  0xda   : > { %p377_p3 = pnand %p380_p2, %p571_p8 }
  0xdc   : > { %484 = dma.done.wait (!%p377_p3), %s298_s27, 3072  }
  0xdd   : > { %486 = vsyncadd (!%p377_p3), %s298_s27, 4294964224  ;;  %s14_s11 = sadd.s32 1, %s509_s11   ;;  %s708_s6 = smov %s493_s7 }
  0xde   : > { %p11_p5 = scmp.ge.s32.totalorder %s14_s11, 4   ;;  %s709_s7 = smov %s497_s8 }
  0xdf   : > { %s710_s8 = smov %s577_s19  ;;  %s711_s9 = smov %s505_s10 }
  0xe0   : > { %s712_s10 = smov %s714_s14  ;;  %13 = sbr.rel (!%p11_p5) target bundleno = 4 (0x4), region = 59 }
  0xe7   :  { %303 = vsyncpa [#allocation3], 1 }
  0xe8   :  { %305 = vsyncpa [#allocation3 + $0x1], 1 }

</bundles_post_ra>
